<compile_context>
chip_gen: v7x
topology: tpu7x:2x2x1
jax: 0.10.0
libtpu: 0.0.40
codegen_flags: <defaults>
</compile_context>

<pallas_src>
import functools

import jax
import jax.numpy as jnp
from jax.experimental import pallas as pl
from jax.experimental.pallas import tpu as pltpu


_MAX_TILE_N = 2048
# Double-buffered input working-set budget (safe under the 32 MiB scoped
# VMEM limit requested below on every TPU generation, incl. v7x).
_VMEM_INPUT_BUDGET = 20 * 1024 * 1024


def _pick_tile_n(n, c, logits_itemsize):
    """Largest batch tile that keeps the double-buffered inputs in budget."""
    if n <= 1024:
        return n  # single block == full array dims (always a legal BlockSpec)
    # Per-row VMEM cost: one logits row + one lane-padded (128-wide) int32
    # target row (the (TILE_N, 1) int32 tile pads to 128 lanes in VMEM).
    per_row = c * logits_itemsize + 128 * 4
    t = _VMEM_INPUT_BUDGET // (2 * per_row)
    t = min(int(t), _MAX_TILE_N, n)
    return max(8, (t // 8) * 8)


def _focal_loss_kernel(logits_ref, targets_ref, out_ref, *, alpha, gamma,
                       n_total, tile_n, reduction, needs_mask):
    logits = logits_ref[...].astype(jnp.float32)          # (tile_n, C)
    tgt = targets_ref[...]                                # (tile_n, 1) int32
    tn, c = logits.shape

    # Numerically stable softmax pieces.
    row_max = jnp.max(logits, axis=-1, keepdims=True)     # (tile_n, 1)
    shifted = logits - row_max
    sumexp = jnp.sum(jnp.exp(shifted), axis=-1, keepdims=True)   # (tile_n, 1)

    # Target gather fused into `shifted` (no explicit one-hot temporary,
    # no second full read of the logits).
    col_ids = jax.lax.broadcasted_iota(jnp.int32, (tn, c), 1)
    tgt_shifted = jnp.sum(jnp.where(col_ids == tgt, shifted, 0.0),
                          axis=-1, keepdims=True)          # (tile_n, 1)

    ce = jnp.log(sumexp) - tgt_shifted                     # -log p_t  (>= 0)
    pt = jnp.exp(tgt_shifted) / sumexp                     # p_t, no exp(-ce) chain

    one_minus_pt = jnp.maximum(1.0 - pt, 0.0)              # clamp ULP negatives
    g = float(gamma)
    if g == 2.0:
        mod = one_minus_pt * one_minus_pt                  # single VPU mul, not pow
    elif g == int(g) and g >= 0.0:
        mod = one_minus_pt ** int(g)                       # lax.integer_pow
    else:
        mod = one_minus_pt ** g
    focal = alpha * mod * ce                               # (tile_n, 1)

    if needs_mask:
        row_ids = (pl.program_id(0) * tile_n
                   + jax.lax.broadcasted_iota(jnp.int32, (tn, 1), 0))
        focal = jnp.where(row_ids < n_total, focal, 0.0)   # select: NaN-safe

    if reduction == "none":
        out_ref[...] = focal                               # (tile_n, 1)
    else:
        # Per-tile partial sum broadcast into a lane-aligned (1, 8, 128)
        # block; the wrapper reads [:, 0, 0] and finishes the reduction.
        out_ref[...] = jnp.broadcast_to(jnp.sum(focal), (1, 8, 128))


def focal_loss(logits, targets, *, alpha=0.25, gamma=2.0, reduction="mean",
               tile_n=None):
    """Pallas TPU focal loss. logits: (N, C); targets: (N,) int class ids."""
    if reduction not in ("mean", "sum", "none"):
        raise ValueError(f"unknown reduction: {reduction!r}")
    n, c = logits.shape
    itemsize = jnp.dtype(logits.dtype).itemsize
    targets2d = targets.astype(jnp.int32).reshape(n, 1)

    if tile_n is None:
        tile_n = _pick_tile_n(n, c, itemsize)
    if tile_n != n and tile_n % 8 != 0:
        raise ValueError("tile_n must equal N or be a multiple of 8")
    num_tiles = pl.cdiv(n, tile_n)
    needs_mask = (num_tiles * tile_n) != n

    kernel = functools.partial(
        _focal_loss_kernel, alpha=float(alpha), gamma=float(gamma),
        n_total=n, tile_n=tile_n, reduction=reduction, needs_mask=needs_mask)

    in_specs = [
        pl.BlockSpec((tile_n, c), lambda i: (i, 0)),       # logits (native dtype)
        pl.BlockSpec((tile_n, 1), lambda i: (i, 0)),       # targets
    ]
    compiler_params = pltpu.CompilerParams(
        dimension_semantics=("parallel",),                 # no carried state
        vmem_limit_bytes=32 * 1024 * 1024,
    )
    out_elems = n if reduction == "none" else num_tiles * 8 * 128
    cost = pl.CostEstimate(
        flops=int(8 * n * c),
        transcendentals=int(n * c + 2 * n),
        bytes_accessed=int(n * c * itemsize + n * 4 + out_elems * 4),
    )

    if reduction == "none":
        out = pl.pallas_call(
            kernel,
            grid=(num_tiles,),
            out_shape=jax.ShapeDtypeStruct((n, 1), jnp.float32),
            in_specs=in_specs,
            out_specs=pl.BlockSpec((tile_n, 1), lambda i: (i, 0)),
            compiler_params=compiler_params,
            cost_estimate=cost,
        )(logits, targets2d)
        return out[:, 0]

    partials = pl.pallas_call(
        kernel,
        grid=(num_tiles,),
        out_shape=jax.ShapeDtypeStruct((num_tiles, 8, 128), jnp.float32),
        in_specs=in_specs,
        out_specs=pl.BlockSpec((1, 8, 128), lambda i: (i, 0, 0)),
        compiler_params=compiler_params,
        cost_estimate=cost,
    )(logits, targets2d)
    total = jnp.sum(partials[:, 0, 0])
    if reduction == "mean":
        return total / jnp.float32(n)
    return total  # 'sum'


# ----------------------------- pure-JAX reference ---------------------------

def _focal_loss_ref_none(logits, targets, alpha=0.25, gamma=2.0):
    logp = jax.nn.log_softmax(logits.astype(jnp.float32), axis=-1)
    ce = -jnp.take_along_axis(logp, targets[:, None].astype(jnp.int32),
                              axis=-1)[:, 0]
    pt = jnp.exp(-ce)
    return alpha * (1.0 - pt) ** gamma * ce


def _focal_loss_ref(logits, targets, alpha=0.25, gamma=2.0):
    return jnp.mean(_focal_loss_ref_none(logits, targets, alpha, gamma))


if __name__ == "__main__":
    key = jax.random.PRNGKey(0)
    k1, k2, k3, k4 = jax.random.split(key, 4)

    # Small shape consistent with the module: logits (N, C), targets (N,).
    N, C = 8, 32
    logits = jax.random.normal(k1, (N, C), dtype=jnp.float32)
    targets = jax.random.randint(k2, (N,), 0, C, dtype=jnp.int32)

    # reduction='mean' (the module default).
    loss = jax.block_until_ready(focal_loss(logits, targets))
    ref = _focal_loss_ref(logits, targets)
    assert jnp.allclose(loss, ref, rtol=1e-5, atol=1e-6), (loss, ref)

    # reduction='none' and 'sum'.
    loss_none = jax.block_until_ready(focal_loss(logits, targets,
                                                 reduction="none"))
    ref_none = _focal_loss_ref_none(logits, targets)
    assert jnp.allclose(loss_none, ref_none, rtol=1e-5, atol=1e-6)

    loss_sum = jax.block_until_ready(focal_loss(logits, targets,
                                                reduction="sum"))
    assert jnp.allclose(loss_sum, jnp.sum(ref_none), rtol=1e-5, atol=1e-6)

    # Multi-tile gridded path with a ragged (masked) last tile.
    N2, C2 = 1000, 32
    logits2 = jax.random.normal(k3, (N2, C2), dtype=jnp.float32)
    targets2 = jax.random.randint(k4, (N2,), 0, C2, dtype=jnp.int32)
    loss2 = jax.block_until_ready(focal_loss(logits2, targets2, tile_n=256))
    ref2 = _focal_loss_ref(logits2, targets2)
    assert jnp.allclose(loss2, ref2, rtol=1e-5, atol=1e-6), (loss2, ref2)

    print("KERNEL_OK")
</pallas_src>

<mosaic_0001>
module attributes {stable_mosaic.version = 11 : i64} {
  func.func @_focal_loss_kernel(%arg0: i32, %arg1: memref<8x32xf32, #tpu.memory_space<vmem>>, %arg2: memref<8x1xi32, #tpu.memory_space<vmem>>, %arg3: memref<1x8x128xf32, #tpu.memory_space<vmem>>) attributes {dimension_semantics = [#tpu.dimension_semantics<parallel>], iteration_bounds = array<i64: 1>, scalar_prefetch = 0 : i64, scratch_operands = 0 : i64, tpu.core_type = #tpu.core_type<tc>, window_params = [{transform_indices = @transform_0, window_bounds = array<i64: 8, 32>}, {transform_indices = @transform_1, window_bounds = array<i64: 8, 1>}, {transform_indices = @transform_2, window_bounds = array<i64: 1, 8, 128>}]} {
    %c0 = arith.constant 0 : index
    %c0_0 = arith.constant 0 : index
    %0 = vector.load %arg1[%c0, %c0_0] : memref<8x32xf32, #tpu.memory_space<vmem>>, vector<8x32xf32>
    %c0_1 = arith.constant 0 : index
    %c0_2 = arith.constant 0 : index
    %1 = vector.load %arg2[%c0_1, %c0_2] : memref<8x1xi32, #tpu.memory_space<vmem>>, vector<8x1xi32>
    %cst = arith.constant dense<0xFF800000> : vector<8xf32>
    %2 = vector.multi_reduction <maximumf>, %0, %cst [1] : vector<8x32xf32> to vector<8xf32>
    %3 = vector.shape_cast %2 : vector<8xf32> to vector<8x1xf32>
    %4 = vector.broadcast %3 : vector<8x1xf32> to vector<8x32xf32>
    %5 = arith.subf %0, %4 : vector<8x32xf32>
    %6 = math.exp %5 : vector<8x32xf32>
    %cst_3 = arith.constant dense<0.000000e+00> : vector<8xf32>
    %7 = vector.multi_reduction <add>, %6, %cst_3 [1] : vector<8x32xf32> to vector<8xf32>
    %8 = vector.shape_cast %7 : vector<8xf32> to vector<8x1xf32>
    %9 = tpu.iota {dimensions = array<i32: 1>} : vector<8x32xi32>
    %10 = vector.broadcast %1 : vector<8x1xi32> to vector<8x32xi32>
    %11 = arith.cmpi eq, %9, %10 : vector<8x32xi32>
    %cst_4 = arith.constant 0.000000e+00 : f32
    %12 = vector.broadcast %cst_4 : f32 to vector<8x32xf32>
    %13 = arith.select %11, %5, %12 : vector<8x32xi1>, vector<8x32xf32>
    %cst_5 = arith.constant dense<0.000000e+00> : vector<8xf32>
    %14 = vector.multi_reduction <add>, %13, %cst_5 [1] : vector<8x32xf32> to vector<8xf32>
    %15 = vector.shape_cast %14 : vector<8xf32> to vector<8x1xf32>
    %16 = math.log %8 : vector<8x1xf32>
    %17 = arith.subf %16, %15 : vector<8x1xf32>
    %18 = math.exp %15 : vector<8x1xf32>
    %19 = arith.divf %18, %8 : vector<8x1xf32>
    %cst_6 = arith.constant 1.000000e+00 : f32
    %20 = vector.broadcast %cst_6 : f32 to vector<8x1xf32>
    %21 = arith.subf %20, %19 : vector<8x1xf32>
    %cst_7 = arith.constant 0.000000e+00 : f32
    %22 = vector.broadcast %cst_7 : f32 to vector<8x1xf32>
    %23 = arith.maximumf %21, %22 : vector<8x1xf32>
    %24 = arith.mulf %23, %23 : vector<8x1xf32>
    %cst_8 = arith.constant 2.500000e-01 : f32
    %25 = vector.broadcast %cst_8 : f32 to vector<8x1xf32>
    %26 = arith.mulf %25, %24 : vector<8x1xf32>
    %27 = arith.mulf %26, %17 : vector<8x1xf32>
    %28 = vector.shape_cast %27 : vector<8x1xf32> to vector<1x8x1xf32>
    %cst_9 = arith.constant dense<0.000000e+00> : vector<1xf32>
    %29 = vector.multi_reduction <add>, %28, %cst_9 [1, 2] : vector<1x8x1xf32> to vector<1xf32>
    %30 = vector.shape_cast %29 : vector<1xf32> to vector<1x1x1xf32>
    %31 = vector.extract %30[0, 0, 0] : f32 from vector<1x1x1xf32>
    %32 = vector.broadcast %31 : f32 to vector<1x8x128xf32>
    %c0_10 = arith.constant 0 : index
    %c0_11 = arith.constant 0 : index
    %c0_12 = arith.constant 0 : index
    %33 = vector.load %arg3[%c0_10, %c0_11, %c0_12] : memref<1x8x128xf32, #tpu.memory_space<vmem>>, vector<1x8x128xf32>
    tpu.vector_store %arg3[%c0_10, %c0_11, %c0_12], %32 {strides = array<i32>} : memref<1x8x128xf32, #tpu.memory_space<vmem>>, vector<1x8x128xf32>,
    return
  }
  func.func @transform_0(%arg0: i32) -> (i32, i32) {
    %c0_i32 = arith.constant 0 : i32
    %c0_i32_0 = arith.constant 0 : i32
    return %arg0, %c0_i32 : i32, i32
  }
  func.func @transform_1(%arg0: i32) -> (i32, i32) {
    %c0_i32 = arith.constant 0 : i32
    %c0_i32_0 = arith.constant 0 : i32
    return %arg0, %c0_i32 : i32, i32
  }
  func.func @transform_2(%arg0: i32) -> (i32, i32, i32) {
    %c0_i32 = arith.constant 0 : i32
    %c0_i32_0 = arith.constant 0 : i32
    %c0_i32_1 = arith.constant 0 : i32
    return %arg0, %c0_i32, %c0_i32_0 : i32, i32, i32
  }
}

</mosaic_0001>

<bundles_post_ra>
// kernel: tpu_custom_call.1
= control target key start
LH: loop header
LB: loop body
LE: loop exit
PB: predicated region body
PF: predicated region fallthrough
CT: control target
= control target key end

     0   :  { %vm14_vm0 = vcmask 261120   ;;  %s148_s0 = inlined_call_operand.vmem [shape: f32[8,32], index: 0, kind: input, shape index: {}]   ;;  %s149_s1 = inlined_call_operand.vmem [shape: s32[8,1], index: 1, kind: input, shape index: {}]   ;;  %s150_s2 = inlined_call_operand.hbm [shape: f32[1,8,128], index: 2, kind: output, shape index: {}]  }
   0x1   :  { %v12_v0 = vld [vmem:[%s148_s0] sm:$0xff] }
   0x2   :  { %7 = vsyncpa [#allocation3], 0  ;;  %v15_v1 = vsel %vm14_vm0, %v12_v0, -inf  ;;  %v110_v2 = vmov 0   ;;  %v13_v3 = vld [vmem:[%s149_s1] sm:$0xff]  ;;  %v24_v6 = vlaneseq  ;;  %vm46_vm2 = vcmask 7168  }
   0x3   :  { %77 = vset.pattern.permute.xlu0 %v110_v2  ;;  %s111_s0 = smov [#allocation2]  }
   0x4   :  { %16 = vmax.xlane.f32.xlu0 %v15_v1  ;;  %v25_v8 = vand.u32 127, %v24_v6  ;;  %s65_s1 = sshll.u32 %s111_s0, 4  ;;  %s66_s1 = int_to_ptr.vmem [resolvable:$true] %s65_s1 }
   0x5   :  { %s86_s14 = scalar_lea.vmem %s66_s1, 128  ;;  %p91_p1 = scmp.lt.s32.totalorder %s66_s1, %s66_s1 }
   0x6   :  { %p87_p0 = scmp.ne.s32.totalorder %s66_s1, %s86_s14  ;;  %p92_p2 = scmp.lt.s32.totalorder %s86_s14, %s86_s14 }
   0x8   :  { %p93_p3 = por %p92_p2, %p91_p1 }
   0xa   :  { %p94_p4 = pnand %p93_p3, %p87_p0 }
  0x1a   :  { %27 = vperm.xlu0 %77, %v13_v3  }
  0x91   :  { %v17_v4 = vpop.xlane.xlu0 %16 }
  0x92   :  { %v18_v5 = vsub.f32 %v12_v0, %v17_v4 }
  0x94   :  { %v19_v7 = vmul.f32 1.442695, %v18_v5 }
  0x96   :  { %78 = vpow2.f32 %v19_v7 }
  0x99   :  { %v28_v9 = vpop.permute.xlu0 %27 }
  0x9a   :  { %vm29_vm1 = vcmp.eq.s32.totalorder %v25_v8, %v28_v9 }
  0x9b   :  { %v30_v10 = vsel %vm29_vm1, %v18_v5, 0.0 }
  0x9c   :  { %v31_v11 = vsel %vm14_vm0, %v30_v10, 0.0 }
  0x9d   :  { %32 = vadd.xlane.f32.xlu1 %v31_v11 }
  0xa0   :  { %v79_v12 = vpop.eup %78 }
  0xa1   :  { %v21_v13 = vsel %vm14_vm0, %v79_v12, 0.0 }
  0xa2   :  { %22 = vadd.xlane.f32.xlu1 %v21_v13 }
 0x12a   :  { %v33_v14 = vpop.xlane.xlu1 %32 }
 0x12b   :  { %v37_v15 = vmul.f32 1.442695, %v33_v14 }
 0x12d   :  { %80 = vpow2.f32 %v37_v15 }
 0x12f   :  { %v23_v16 = vpop.xlane.xlu1 %22 }
 0x130   :  { %82 = vrcp.f32 %v23_v16 }
 0x131   :  { %84 = vlog2.f32 %v23_v16 }
 0x137   :  { %v81_v17 = vpop.eup %80 }
 0x13a   :  { %v83_v18 = vpop.eup %82 }
 0x13b   :  { %v40_v19 = vmul.f32 %v83_v18, %v81_v17  ;;  %v85_v20 = vpop.eup %84 }
 0x13c   :  { %v35_v22 = vmul.f32 0.6931472, %v85_v20 }
 0x13d   :  { %v41_v21 = vsub.f32 1.0, %v40_v19 }
 0x13e   :  { %v36_v25 = vsub.f32 %v35_v22, %v33_v14 }
 0x13f   :  { %v42_v23 = vmax.f32 %v41_v21, 0.0 }
 0x141   :  { %v43_v24 = vmul.f32 %v42_v23, %v42_v23 }
 0x143   :  { %v44_v26 = vmul.f32 0.25, %v43_v24 }
 0x145   :  { %v45_v27 = vmul.f32 %v44_v26, %v36_v25 }
 0x147   :  { %v47_v28 = vsel %vm46_vm2, %v45_v27, 0.0 }
 0x148   :  { %48 = vadd.xlane.f32.xlu1 %v47_v28 }
 0x1d5   :  { %v49_v29 = vpop.xlane.xlu1 %48 }
 0x1d6   :  { %v50_v30 = vrot.slane %v49_v29, 4 }
 0x1d8   :  { %v51_v31 = vadd.f32 %v50_v30, %v49_v29 }
 0x1da   :  { %v52_v32 = vrot.slane %v51_v31, 2 }
 0x1dc   :  { %v53_v33 = vadd.f32 %v52_v32, %v51_v31 }
 0x1de   :  { %v54_v34 = vrot.slane %v53_v33, 1 }
 0x1e0   :  { %v55_v35 = vadd.f32 %v54_v34, %v53_v33 }
 0x1e2   :  { %73 = vpush %v55_v35 }
 0x213   :  { %s74_s13 = spop %73 }
 0x214   :  { %v57_v36 = vstv %s74_s13 }
 0x215   :  { %58 = vst [vmem:[#allocation2] sm:$0xff] %v57_v36 }
 0x216   :  { %97 = shalt.err (!%p94_p4)
}
 0x217   :  { %s98_s17 = scalar_lea.hbm %s150_s2, 128 }
 0x218   :  { %p99_p5 = scmp.ne.s32.totalorder %s150_s2, %s98_s17  ;;  %p102_p6 = scmp.lt.u32.totalorder %s98_s17, %s150_s2 }
 0x21a   :  { %p104_p7 = pnand %p102_p6, %p99_p5 }
 0x21c   :  { %107 = shalt.err (!%p104_p7)
}
 0x21d   :  { %68 = dma.vmem_to_hbm [thread:$0]  %s66_s1, 128, %s150_s2, [#allocation3]  }
 0x21e   :  { %108 = dma.done.wait [#allocation3], 128  }
 0x21f   :  { %109 = vsyncadd [#allocation3], 4294967168 }
 0x220   :  { %72 = vsyncpa [#allocation3], 1 }

</bundles_post_ra>
